<compile_context>
chip_gen: v6e
topology: v6e:2x2x1
jax: 0.10.0
libtpu: 0.0.40
codegen_flags: <defaults>
</compile_context>

<pallas_src>
import functools

import jax
import jax.numpy as jnp
from jax import lax
from jax.experimental import pallas as pl
from jax.experimental.pallas import tpu as pltpu

_LANES = 128


def _relu(v):
    return jnp.maximum(v, 0.0)


def _round_up(n, m):
    return -(-n // m) * m


# ----------------------------------------------------------------------------
# Kernel
# ----------------------------------------------------------------------------
def actor_critic_kernel(x_ref, w_ref, out_ref, *, S, H, A):
    """Fused forward pass. All parameters live in one (R, 128) VMEM slab."""
    # Static row offsets into the packed weight slab (zero-cost ref slices).
    r_w1 = 0
    r_w2 = r_w1 + S
    r_wns = r_w2 + H
    r_wzf = r_wns + H            # fused [ws1_z | wc_z | wa_z]   (H, H+1+A)
    r_wzvf = r_wzf + H           # fused [ws1_zv | wc_zv]        (H, H+1)
    r_wnzf = r_wzvf + H          # fused [wd1 | wa_nz]           (H, H+A)
    r_wd2 = r_wnzf + H
    r_misc = r_wd2 + H           # 8 misc rows (ws1_v, ws2^T/bs2, biases)

    f32 = jnp.float32
    x = x_ref[...]                                          # (bb, S)

    w1 = w_ref[r_w1:r_w1 + S, 0:H]
    w2 = w_ref[r_w2:r_w2 + H, 0:H]
    wns = w_ref[r_wns:r_wns + H, 0:H]
    wzf = w_ref[r_wzf:r_wzf + H, 0:H + 1 + A]
    wzvf = w_ref[r_wzvf:r_wzvf + H, 0:H + 1]
    wnzf = w_ref[r_wnzf:r_wnzf + H, 0:H + A]
    wd2 = w_ref[r_wd2:r_wd2 + H, 0:S]

    ws1_v = w_ref[r_misc + 0:r_misc + 1, 0:H]               # (1, H)
    ws2_r = w_ref[r_misc + 1:r_misc + 2, 0:H]               # (1, H) = ws2^T
    bs2 = w_ref[r_misc + 1:r_misc + 2, H:H + 1]             # (1, 1)
    b1 = w_ref[r_misc + 2:r_misc + 3, 0:H]
    b2 = w_ref[r_misc + 3:r_misc + 4, 0:H]
    bns = w_ref[r_misc + 4:r_misc + 5, 0:H]
    zb = w_ref[r_misc + 5:r_misc + 6, 0:H + 1 + A]          # [bs1 | bc | ba]
    bd1 = w_ref[r_misc + 6:r_misc + 7, 0:H]
    bd2 = w_ref[r_misc + 7:r_misc + 8, 0:S]

    # Trunk.
    h = _relu(jnp.dot(x, w1, preferred_element_type=f32) + b1)
    z = _relu(jnp.dot(h, w2, preferred_element_type=f32) + b2)
    zv = _relu(jnp.dot(z, wns, preferred_element_type=f32) + bns)

    # Fused heads sharing z / zv as LHS.
    # zz column layout: [0:H] -> ws1_z(+bs1), [H:H+1] -> wc_z(+bc),
    #                   [H+1:H+1+A] -> wa_z(+ba)
    zz = jnp.dot(z, wzf, preferred_element_type=f32) + zb   # (bb, H+1+A)
    vv = jnp.dot(zv, wzvf, preferred_element_type=f32)      # (bb, H+1)

    # Critic head consumes the UN-normalized z_vector (matches PyTorch order).
    value = zz[:, H:H + 1] + vv[:, H:H + 1]                 # (bb, 1)

    # F.normalize(zv, p=2, dim=1): zv / max(||zv||, 1e-12)
    ss = jnp.sum(zv * zv, axis=-1, keepdims=True)
    inv = lax.rsqrt(jnp.maximum(ss, 1e-24))                 # EUP rsqrt, free slot
    zv_n = zv * inv

    # state_scalar: the row scale commutes with the matmul, so reuse vv.
    s_h = _relu(zz[:, 0:H] + vv[:, 0:H] * inv + value * ws1_v)
    # H -> 1 head on VPU + lane reduce instead of a 1-column MXU pass.
    scalar = jax.nn.sigmoid(
        jnp.sum(s_h * ws2_r, axis=-1, keepdims=True) + bs2)

    next_z = z + zv_n * scalar

    # Fused next_z heads: [state_decode[0] | actor_head(next_z half)].
    nz = jnp.dot(next_z, wnzf, preferred_element_type=f32)  # (bb, H+A)
    d_h = _relu(nz[:, 0:H] + bd1)
    dec = jnp.dot(d_h, wd2, preferred_element_type=f32) + bd2
    logits = zz[:, H + 1:H + 1 + A] + nz[:, H:H + A]

    # Lane-dense packed output: single unmasked store, single writeback DMA.
    bb = x.shape[0]
    used = A + 1 + 2 * H + S
    pad = jnp.zeros((bb, _LANES - used), f32)
    out_ref[...] = jnp.concatenate(
        [logits, value, next_z, zv_n, dec, pad], axis=-1)


# ----------------------------------------------------------------------------
# Parameters (PyTorch-style init) + offline packing into one slab
# ----------------------------------------------------------------------------
def _linear_params(key, fan_in, fan_out):
    """U(-1/sqrt(fan_in), 1/sqrt(fan_in)); weight stored as (in, out)."""
    kw, kb = jax.random.split(key)
    bound = 1.0 / jnp.sqrt(jnp.float32(fan_in))
    w = jax.random.uniform(kw, (fan_in, fan_out), jnp.float32, -bound, bound)
    b = jax.random.uniform(kb, (1, fan_out), jnp.float32, -bound, bound)
    return w, b


def make_params(key, state_size, action_size, hidden_dim):
    keys = jax.random.split(key, 9)
    H = hidden_dim
    w1, b1 = _linear_params(keys[0], state_size, H)            # fc1
    w2, b2 = _linear_params(keys[1], H, H)                     # fc2
    wns, bns = _linear_params(keys[2], H, H)                   # next_state
    wc, bc = _linear_params(keys[3], 2 * H, 1)                 # critic_head
    ws1, bs1 = _linear_params(keys[4], 2 * H + 1, H)           # state_scalar[0]
    ws2, bs2 = _linear_params(keys[5], H, 1)                   # state_scalar[2]
    wd1, bd1 = _linear_params(keys[6], H, H)                   # state_decode[0]
    wd2, bd2 = _linear_params(keys[7], H, state_size)          # state_decode[2]
    wa, ba = _linear_params(keys[8], 2 * H, action_size)       # actor_head
    return dict(w1=w1, b1=b1, w2=w2, b2=b2, wns=wns, bns=bns,
                wc=wc, bc=bc, ws1=ws1, bs1=bs1, ws2=ws2, bs2=bs2,
                wd1=wd1, bd1=bd1, wd2=wd2, bd2=bd2, wa=wa, ba=ba)


def _check_widths(state_size, action_size, hidden_dim):
    S, H, A = state_size, hidden_dim, action_size
    assert S <= _LANES and H <= _LANES, "weight column count must be <= 128"
    assert H + 1 + A <= _LANES, "fused z-head [ws1_z|wc_z|wa_z] exceeds 128 lanes"
    assert H + A <= _LANES, "fused next_z-head [wd1|wa_nz] exceeds 128 lanes"
    assert A + 1 + 2 * H + S <= _LANES, "packed output slab exceeds 128 lanes"


def pack_params(p, state_size, action_size, hidden_dim):
    """Pack every weight/bias into one lane-dense (S + 6H + 8, 128) f32 slab."""
    _check_widths(state_size, action_size, hidden_dim)
    S, H, A = state_size, hidden_dim, action_size
    R = S + 6 * H + 8
    slab = jnp.zeros((R, _LANES), jnp.float32)

    wc_z, wc_zv = p["wc"][:H], p["wc"][H:2 * H]
    ws1_z, ws1_zv, ws1_v = p["ws1"][:H], p["ws1"][H:2 * H], p["ws1"][2 * H:]
    wa_z, wa_nz = p["wa"][:H], p["wa"][H:2 * H]

    wzf = jnp.concatenate([ws1_z, wc_z, wa_z], axis=1)       # (H, H+1+A)
    wzvf = jnp.concatenate([ws1_zv, wc_zv], axis=1)          # (H, H+1)
    wnzf = jnp.concatenate([p["wd1"], wa_nz], axis=1)        # (H, H+A)
    zb = jnp.concatenate([p["bs1"], p["bc"], p["ba"]], axis=1)

    def put(s, mat, r0):
        return s.at[r0:r0 + mat.shape[0], 0:mat.shape[1]].set(mat)

    r = 0
    slab = put(slab, p["w1"], r);  r += S
    slab = put(slab, p["w2"], r);  r += H
    slab = put(slab, p["wns"], r); r += H
    slab = put(slab, wzf, r);      r += H
    slab = put(slab, wzvf, r);     r += H
    slab = put(slab, wnzf, r);     r += H
    slab = put(slab, p["wd2"], r); r += H
    # Misc block (8 rows).
    slab = put(slab, ws1_v, r + 0)
    slab = put(slab, p["ws2"].T, r + 1)
    slab = slab.at[r + 1:r + 2, H:H + 1].set(p["bs2"])
    slab = put(slab, p["b1"], r + 2)
    slab = put(slab, p["b2"], r + 3)
    slab = put(slab, p["bns"], r + 4)
    slab = put(slab, zb, r + 5)
    slab = put(slab, p["bd1"], r + 6)
    slab = put(slab, p["bd2"], r + 7)
    return slab


# ----------------------------------------------------------------------------
# Batch-tile selection + wrapper
# ----------------------------------------------------------------------------
def _choose_block_batch(B, block_batch=None):
    """Pick a batch tile: large (amortize ~0.35us/step + serial MXU chain),
    a multiple of 8, and producing >=2 grid blocks once B >= 16 so the
    "parallel" batch axis can shard across both v7x TensorCores."""
    MAX_BB = 4096   # out 2 MiB + x 256 KiB per buffer: well under scoped VMEM
    if block_batch is None:
        block_batch = min(MAX_BB, max(8, _round_up(-(-B // 2), 8)))
    bb = min(block_batch, _round_up(B, 8))
    return max(8, _round_up(bb, 8))


def actor_critic_forward(x, packed_w, state_size, action_size, hidden_dim,
                         *, block_batch=None):
    S, H, A = state_size, hidden_dim, action_size
    _check_widths(S, A, H)
    assert x.shape[1] == S

    B = x.shape[0]
    bb = _choose_block_batch(B, block_batch)
    n_blocks = -(-B // bb)
    Bp = n_blocks * bb
    if Bp != B:
        x = jnp.pad(x, ((0, Bp - B), (0, 0)))

    kernel = functools.partial(actor_critic_kernel, S=S, H=H, A=A)
    out = pl.pallas_call(
        kernel,
        out_shape=jax.ShapeDtypeStruct((Bp, _LANES), jnp.float32),
        grid=(n_blocks,),
        in_specs=[
            pl.BlockSpec((bb, S), lambda i: (i, 0)),
            # Constant index_map: the 84 KiB weight slab is fetched once and
            # not re-DMA'd per grid step.
            pl.BlockSpec(packed_w.shape, lambda i: (0, 0)),
        ],
        out_specs=pl.BlockSpec((bb, _LANES), lambda i: (i, 0)),
        compiler_params=pltpu.CompilerParams(
            dimension_semantics=("parallel",)),
    )(x, packed_w)

    out = out[:B]
    c = 0
    logits = out[:, c:c + A]; c += A
    value = out[:, c:c + 1]; c += 1
    next_z = out[:, c:c + H]; c += H
    zvec = out[:, c:c + H]; c += H
    dec = out[:, c:c + S]
    return logits, value, next_z, zvec, dec


# ----------------------------------------------------------------------------
# Pure-JAX reference (mirrors the PyTorch forward) for correctness check
# ----------------------------------------------------------------------------
def reference_forward(x, p):
    relu = lambda v: jnp.maximum(v, 0.0)
    h = relu(x @ p["w1"] + p["b1"])
    z = relu(h @ p["w2"] + p["b2"])
    zv = relu(z @ p["wns"] + p["bns"])
    value = jnp.concatenate([z, zv], axis=1) @ p["wc"] + p["bc"]
    norm = jnp.sqrt(jnp.sum(zv * zv, axis=1, keepdims=True))
    zv_n = zv / jnp.maximum(norm, 1e-12)
    s_in = jnp.concatenate([z, zv_n, value], axis=1)
    s_h = relu(s_in @ p["ws1"] + p["bs1"])
    scalar = jax.nn.sigmoid(s_h @ p["ws2"] + p["bs2"])
    next_z = z + zv_n * scalar
    d_h = relu(next_z @ p["wd1"] + p["bd1"])
    dec = d_h @ p["wd2"] + p["bd2"]
    logits = jnp.concatenate([z, next_z], axis=1) @ p["wa"] + p["ba"]
    return logits, value, next_z, zv_n, dec


if __name__ == "__main__":
    batch = 8
    state_size = 16
    action_size = 4
    hidden_dim = 24

    key = jax.random.PRNGKey(0)
    k_params, k_x = jax.random.split(key)
    params = make_params(k_params, state_size, action_size, hidden_dim)
    packed_w = pack_params(params, state_size, action_size, hidden_dim)
    x = jax.random.normal(k_x, (batch, state_size), jnp.float32)

    outs = actor_critic_forward(x, packed_w, state_size, action_size,
                                hidden_dim)
    outs = jax.block_until_ready(outs)
    logits, value, next_z, z_vector, decoded = outs

    assert logits.shape == (batch, action_size)
    assert value.shape == (batch, 1)
    assert next_z.shape == (batch, hidden_dim)
    assert z_vector.shape == (batch, hidden_dim)
    assert decoded.shape == (batch, state_size)

    ref = reference_forward(x, params)
    for got, want in zip(outs, ref):
        assert jnp.allclose(got, want, atol=2e-3, rtol=2e-3), (
            "mismatch vs reference")

    print("KERNEL_OK")
</pallas_src>

<mosaic_0001>
module attributes {stable_mosaic.version = 11 : i64} {
  func.func @actor_critic_kernel(%arg0: i32, %arg1: memref<8x16xf32, #tpu.memory_space<vmem>>, %arg2: memref<168x128xf32, #tpu.memory_space<vmem>>, %arg3: memref<8x128xf32, #tpu.memory_space<vmem>>) attributes {dimension_semantics = [#tpu.dimension_semantics<parallel>], iteration_bounds = array<i64: 1>, scalar_prefetch = 0 : i64, scratch_operands = 0 : i64, tpu.core_type = #tpu.core_type<tc>, window_params = [{transform_indices = @transform_0, window_bounds = array<i64: 8, 16>}, {pipeline_mode = #tpu.pipeline_mode<synchronous>, transform_indices = @transform_1, window_bounds = array<i64: 168, 128>}, {transform_indices = @transform_2, window_bounds = array<i64: 8, 128>}]} {
    %c0 = arith.constant 0 : index
    %c0_0 = arith.constant 0 : index
    %0 = vector.load %arg1[%c0, %c0_0] : memref<8x16xf32, #tpu.memory_space<vmem>>, vector<8x16xf32>
    %c0_1 = arith.constant 0 : index
    %c0_2 = arith.constant 0 : index
    %1 = vector.load %arg2[%c0_1, %c0_2] : memref<168x128xf32, #tpu.memory_space<vmem>>, vector<16x24xf32>
    %c16 = arith.constant 16 : index
    %c0_3 = arith.constant 0 : index
    %2 = vector.load %arg2[%c16, %c0_3] : memref<168x128xf32, #tpu.memory_space<vmem>>, vector<24x24xf32>
    %c40 = arith.constant 40 : index
    %c0_4 = arith.constant 0 : index
    %3 = vector.load %arg2[%c40, %c0_4] : memref<168x128xf32, #tpu.memory_space<vmem>>, vector<24x24xf32>
    %c64 = arith.constant 64 : index
    %c0_5 = arith.constant 0 : index
    %4 = vector.load %arg2[%c64, %c0_5] : memref<168x128xf32, #tpu.memory_space<vmem>>, vector<24x29xf32>
    %c88 = arith.constant 88 : index
    %c0_6 = arith.constant 0 : index
    %5 = vector.load %arg2[%c88, %c0_6] : memref<168x128xf32, #tpu.memory_space<vmem>>, vector<24x25xf32>
    %c112 = arith.constant 112 : index
    %c0_7 = arith.constant 0 : index
    %6 = vector.load %arg2[%c112, %c0_7] : memref<168x128xf32, #tpu.memory_space<vmem>>, vector<24x28xf32>
    %c136 = arith.constant 136 : index
    %c0_8 = arith.constant 0 : index
    %7 = vector.load %arg2[%c136, %c0_8] : memref<168x128xf32, #tpu.memory_space<vmem>>, vector<24x16xf32>
    %c160 = arith.constant 160 : index
    %c0_9 = arith.constant 0 : index
    %8 = vector.load %arg2[%c160, %c0_9] : memref<168x128xf32, #tpu.memory_space<vmem>>, vector<1x24xf32>
    %c161 = arith.constant 161 : index
    %c0_10 = arith.constant 0 : index
    %9 = vector.load %arg2[%c161, %c0_10] : memref<168x128xf32, #tpu.memory_space<vmem>>, vector<1x24xf32>
    %c161_11 = arith.constant 161 : index
    %c24 = arith.constant 24 : index
    %10 = vector.load %arg2[%c161_11, %c24] : memref<168x128xf32, #tpu.memory_space<vmem>>, vector<1x1xf32>
    %c162 = arith.constant 162 : index
    %c0_12 = arith.constant 0 : index
    %11 = vector.load %arg2[%c162, %c0_12] : memref<168x128xf32, #tpu.memory_space<vmem>>, vector<1x24xf32>
    %c163 = arith.constant 163 : index
    %c0_13 = arith.constant 0 : index
    %12 = vector.load %arg2[%c163, %c0_13] : memref<168x128xf32, #tpu.memory_space<vmem>>, vector<1x24xf32>
    %c164 = arith.constant 164 : index
    %c0_14 = arith.constant 0 : index
    %13 = vector.load %arg2[%c164, %c0_14] : memref<168x128xf32, #tpu.memory_space<vmem>>, vector<1x24xf32>
    %c165 = arith.constant 165 : index
    %c0_15 = arith.constant 0 : index
    %14 = vector.load %arg2[%c165, %c0_15] : memref<168x128xf32, #tpu.memory_space<vmem>>, vector<1x29xf32>
    %c166 = arith.constant 166 : index
    %c0_16 = arith.constant 0 : index
    %15 = vector.load %arg2[%c166, %c0_16] : memref<168x128xf32, #tpu.memory_space<vmem>>, vector<1x24xf32>
    %c167 = arith.constant 167 : index
    %c0_17 = arith.constant 0 : index
    %16 = vector.load %arg2[%c167, %c0_17] : memref<168x128xf32, #tpu.memory_space<vmem>>, vector<1x16xf32>
    %cst = arith.constant dense<0.000000e+00> : vector<8x24xf32>
    %17 = tpu.matmul %0, %1, %cst {dimension_numbers = #tpu.dot_dimension_numbers<[1], [0], [0], [1], [0, 0, 1, 1], [], []>} : vector<8x16xf32>, vector<16x24xf32>, vector<8x24xf32> -> vector<8x24xf32>
    %18 = vector.broadcast %11 : vector<1x24xf32> to vector<8x24xf32>
    %19 = arith.addf %17, %18 : vector<8x24xf32>
    %cst_18 = arith.constant 0.000000e+00 : f32
    %20 = vector.broadcast %cst_18 : f32 to vector<8x24xf32>
    %21 = arith.maximumf %19, %20 : vector<8x24xf32>
    %cst_19 = arith.constant dense<0.000000e+00> : vector<8x24xf32>
    %22 = tpu.matmul %21, %2, %cst_19 {dimension_numbers = #tpu.dot_dimension_numbers<[1], [0], [0], [1], [0, 0, 1, 1], [], []>} : vector<8x24xf32>, vector<24x24xf32>, vector<8x24xf32> -> vector<8x24xf32>
    %23 = vector.broadcast %12 : vector<1x24xf32> to vector<8x24xf32>
    %24 = arith.addf %22, %23 : vector<8x24xf32>
    %cst_20 = arith.constant 0.000000e+00 : f32
    %25 = vector.broadcast %cst_20 : f32 to vector<8x24xf32>
    %26 = arith.maximumf %24, %25 : vector<8x24xf32>
    %cst_21 = arith.constant dense<0.000000e+00> : vector<8x24xf32>
    %27 = tpu.matmul %26, %3, %cst_21 {dimension_numbers = #tpu.dot_dimension_numbers<[1], [0], [0], [1], [0, 0, 1, 1], [], []>} : vector<8x24xf32>, vector<24x24xf32>, vector<8x24xf32> -> vector<8x24xf32>
    %28 = vector.broadcast %13 : vector<1x24xf32> to vector<8x24xf32>
    %29 = arith.addf %27, %28 : vector<8x24xf32>
    %cst_22 = arith.constant 0.000000e+00 : f32
    %30 = vector.broadcast %cst_22 : f32 to vector<8x24xf32>
    %31 = arith.maximumf %29, %30 : vector<8x24xf32>
    %cst_23 = arith.constant dense<0.000000e+00> : vector<8x29xf32>
    %32 = tpu.matmul %26, %4, %cst_23 {dimension_numbers = #tpu.dot_dimension_numbers<[1], [0], [0], [1], [0, 0, 1, 1], [], []>} : vector<8x24xf32>, vector<24x29xf32>, vector<8x29xf32> -> vector<8x29xf32>
    %33 = vector.broadcast %14 : vector<1x29xf32> to vector<8x29xf32>
    %34 = arith.addf %32, %33 : vector<8x29xf32>
    %cst_24 = arith.constant dense<0.000000e+00> : vector<8x25xf32>
    %35 = tpu.matmul %31, %5, %cst_24 {dimension_numbers = #tpu.dot_dimension_numbers<[1], [0], [0], [1], [0, 0, 1, 1], [], []>} : vector<8x24xf32>, vector<24x25xf32>, vector<8x25xf32> -> vector<8x25xf32>
    %36 = vector.extract_strided_slice %34 {offsets = [0, 24], sizes = [8, 1], strides = [1, 1]} : vector<8x29xf32> to vector<8x1xf32>
    %37 = vector.extract_strided_slice %35 {offsets = [0, 24], sizes = [8, 1], strides = [1, 1]} : vector<8x25xf32> to vector<8x1xf32>
    %38 = arith.addf %36, %37 : vector<8x1xf32>
    %39 = arith.mulf %31, %31 : vector<8x24xf32>
    %cst_25 = arith.constant dense<0.000000e+00> : vector<8xf32>
    %40 = vector.multi_reduction <add>, %39, %cst_25 [1] : vector<8x24xf32> to vector<8xf32>
    %41 = vector.shape_cast %40 : vector<8xf32> to vector<8x1xf32>
    %cst_26 = arith.constant 1.000000e-24 : f32
    %42 = vector.broadcast %cst_26 : f32 to vector<8x1xf32>
    %43 = arith.maximumf %41, %42 : vector<8x1xf32>
    %44 = math.rsqrt %43 : vector<8x1xf32>
    %45 = vector.broadcast %44 : vector<8x1xf32> to vector<8x24xf32>
    %46 = arith.mulf %31, %45 : vector<8x24xf32>
    %47 = vector.extract_strided_slice %34 {offsets = [0, 0], sizes = [8, 24], strides = [1, 1]} : vector<8x29xf32> to vector<8x24xf32>
    %48 = vector.extract_strided_slice %35 {offsets = [0, 0], sizes = [8, 24], strides = [1, 1]} : vector<8x25xf32> to vector<8x24xf32>
    %49 = vector.broadcast %44 : vector<8x1xf32> to vector<8x24xf32>
    %50 = arith.mulf %48, %49 : vector<8x24xf32>
    %51 = arith.addf %47, %50 : vector<8x24xf32>
    %52 = vector.broadcast %38 : vector<8x1xf32> to vector<8x24xf32>
    %53 = vector.broadcast %8 : vector<1x24xf32> to vector<8x24xf32>
    %54 = arith.mulf %52, %53 : vector<8x24xf32>
    %55 = arith.addf %51, %54 : vector<8x24xf32>
    %cst_27 = arith.constant 0.000000e+00 : f32
    %56 = vector.broadcast %cst_27 : f32 to vector<8x24xf32>
    %57 = arith.maximumf %55, %56 : vector<8x24xf32>
    %58 = vector.broadcast %9 : vector<1x24xf32> to vector<8x24xf32>
    %59 = arith.mulf %57, %58 : vector<8x24xf32>
    %cst_28 = arith.constant dense<0.000000e+00> : vector<8xf32>
    %60 = vector.multi_reduction <add>, %59, %cst_28 [1] : vector<8x24xf32> to vector<8xf32>
    %61 = vector.shape_cast %60 : vector<8xf32> to vector<8x1xf32>
    %62 = vector.broadcast %10 : vector<1x1xf32> to vector<8x1xf32>
    %63 = arith.addf %61, %62 : vector<8x1xf32>
    %64 = arith.negf %63 : vector<8x1xf32>
    %65 = math.exp %64 : vector<8x1xf32>
    %cst_29 = arith.constant 1.000000e+00 : f32
    %66 = vector.broadcast %cst_29 : f32 to vector<8x1xf32>
    %67 = arith.addf %66, %65 : vector<8x1xf32>
    %68 = arith.divf %66, %67 : vector<8x1xf32>
    %69 = vector.broadcast %68 : vector<8x1xf32> to vector<8x24xf32>
    %70 = arith.mulf %46, %69 : vector<8x24xf32>
    %71 = arith.addf %26, %70 : vector<8x24xf32>
    %cst_30 = arith.constant dense<0.000000e+00> : vector<8x28xf32>
    %72 = tpu.matmul %71, %6, %cst_30 {dimension_numbers = #tpu.dot_dimension_numbers<[1], [0], [0], [1], [0, 0, 1, 1], [], []>} : vector<8x24xf32>, vector<24x28xf32>, vector<8x28xf32> -> vector<8x28xf32>
    %73 = vector.extract_strided_slice %72 {offsets = [0, 0], sizes = [8, 24], strides = [1, 1]} : vector<8x28xf32> to vector<8x24xf32>
    %74 = vector.broadcast %15 : vector<1x24xf32> to vector<8x24xf32>
    %75 = arith.addf %73, %74 : vector<8x24xf32>
    %cst_31 = arith.constant 0.000000e+00 : f32
    %76 = vector.broadcast %cst_31 : f32 to vector<8x24xf32>
    %77 = arith.maximumf %75, %76 : vector<8x24xf32>
    %cst_32 = arith.constant dense<0.000000e+00> : vector<8x16xf32>
    %78 = tpu.matmul %77, %7, %cst_32 {dimension_numbers = #tpu.dot_dimension_numbers<[1], [0], [0], [1], [0, 0, 1, 1], [], []>} : vector<8x24xf32>, vector<24x16xf32>, vector<8x16xf32> -> vector<8x16xf32>
    %79 = vector.broadcast %16 : vector<1x16xf32> to vector<8x16xf32>
    %80 = arith.addf %78, %79 : vector<8x16xf32>
    %81 = vector.extract_strided_slice %34 {offsets = [0, 25], sizes = [8, 4], strides = [1, 1]} : vector<8x29xf32> to vector<8x4xf32>
    %82 = vector.extract_strided_slice %72 {offsets = [0, 24], sizes = [8, 4], strides = [1, 1]} : vector<8x28xf32> to vector<8x4xf32>
    %83 = arith.addf %81, %82 : vector<8x4xf32>
    %cst_33 = arith.constant 0.000000e+00 : f32
    %84 = vector.broadcast %cst_33 : f32 to vector<8x59xf32>
    %85 = tpu.concatenate %83, %38, %71, %46, %80, %84 in 1 : vector<8x4xf32>, vector<8x1xf32>, vector<8x24xf32>, vector<8x24xf32>, vector<8x16xf32>, vector<8x59xf32> -> vector<8x128xf32>
    %c0_34 = arith.constant 0 : index
    %c0_35 = arith.constant 0 : index
    %86 = vector.load %arg3[%c0_34, %c0_35] : memref<8x128xf32, #tpu.memory_space<vmem>>, vector<8x128xf32>
    tpu.vector_store %arg3[%c0_34, %c0_35], %85 {strides = array<i32>} : memref<8x128xf32, #tpu.memory_space<vmem>>, vector<8x128xf32>,
    return
  }
  func.func @transform_0(%arg0: i32) -> (i32, i32) {
    %c0_i32 = arith.constant 0 : i32
    %c0_i32_0 = arith.constant 0 : i32
    return %arg0, %c0_i32 : i32, i32
  }
  func.func @transform_1(%arg0: i32) -> (i32, i32) {
    %c0_i32 = arith.constant 0 : i32
    %c0_i32_0 = arith.constant 0 : i32
    %c0_i32_1 = arith.constant 0 : i32
    return %c0_i32, %c0_i32_0 : i32, i32
  }
  func.func @transform_2(%arg0: i32) -> (i32, i32) {
    %c0_i32 = arith.constant 0 : i32
    %c0_i32_0 = arith.constant 0 : i32
    return %arg0, %c0_i32 : i32, i32
  }
}

</mosaic_0001>

<bundles_post_ra>
// kernel: tpu_custom_call.1
= control target key start
LH: loop header
LB: loop body
LE: loop exit
PB: predicated region body
PF: predicated region fallthrough
CT: control target
= control target key end

     0   :  { %7 = vsyncpa [#allocation3], 0  ;;  %s982_s0 = inlined_call_operand.hbm [shape: f32[8,16], index: 0, kind: input, shape index: {}]   ;;  %s983_s1 = inlined_call_operand.hbm [shape: f32[168,128], index: 1, kind: input, shape index: {}]   ;;  %s984_s2 = inlined_call_operand.hbm [shape: f32[8,128], index: 2, kind: output, shape index: {}]  }
   0x1   :  { %8 = vsyncpa [#allocation6], 0 }
   0x2   :  { %9 = vsyncpa [#allocation4], 0  ;;  %s892_s9 = smov [#allocation2]   ;;  %s893_s11 = smov [#allocation5]  }
   0x3   :  { %s16_s10 = sshll.u32 %s892_s9, 4  ;;  %s25_s12 = sshll.u32 %s893_s11, 4  ;;  %s17_s10 = int_to_ptr.vmem [resolvable:$true] %s16_s10  ;;  %s26_s12 = int_to_ptr.vmem [resolvable:$true] %s25_s12 }
   0x4   :  { %s834_s13 = scalar_lea.vmem %s17_s10, 128  ;;  %p839_p1 = scmp.lt.s32.totalorder %s17_s10, %s17_s10 }
   0x5   :  { %p835_p0 = scmp.ne.s32.totalorder %s17_s10, %s834_s13  ;;  %p840_p2 = scmp.lt.s32.totalorder %s834_s13, %s834_s13 }
   0x7   :  { %p841_p3 = por %p840_p2, %p839_p1 }
   0x9   :  { %p842_p4 = pnand %p841_p3, %p835_p0 }
   0xb   :  { %845 = shalt.err (!%p842_p4)
}
   0xc   :  { %19 = dma.hbm_to_vmem [thread:$0]  %s982_s0, 128, %s17_s10, [#allocation3]  }
   0xd   :  { %s854_s16 = scalar_lea.vmem %s26_s12, 2688  ;;  %p859_p6 = scmp.lt.s32.totalorder %s26_s12, %s26_s12 }
   0xe   :  { %p855_p5 = scmp.ne.s32.totalorder %s26_s12, %s854_s16  ;;  %p860_p7 = scmp.lt.s32.totalorder %s854_s16, %s854_s16 }
  0x10   :  { %p861_p8 = por %p860_p7, %p859_p6 }
  0x12   :  { %p862_p9 = pnand %p861_p8, %p855_p5 }
  0x14   :  { %865 = shalt.err (!%p862_p9)
}
  0x15   :  { %s894_s17 = smov 128   ;;  %s895_s18 = smov 8  }
  0x16   :  { %31 = dma.hbm_to_vmem [thread:$0]  %s983_s1, 2688, %s26_s12, [#allocation6], %s894_s17, %s894_s17, %s895_s18  }
  0x17   :  { %886 = dma.done.wait [#allocation3], 128  }
  0x18   :  { %887 = vsyncadd [#allocation3], 4294967168 }
  0x19   :  { %888 = dma.done.wait [#allocation6], 2688  }
  0x1a   :  { %889 = vsyncadd [#allocation6], 4294964608  ;;  %v896_v0 = vmov 0.0   ;;  %vm897_vm0 = vmmov 0   ;;  %v40_v1 = vld [vmem:[#allocation5 + $0x8] sm:$0xff]  ;;  %v39_v2 = vld [vmem:[#allocation5] sm:$0xff] }
  0x1b   :  { %743 = vmatprep.subr.mxu0 %v896_v0  ;;  %747 = vmatprep.mubr.msk.f32.mxu0 %vm897_vm0, %v896_v0  ;;  %v38_v3 = vld [vmem:[#allocation2] sm:$0xff]  ;;  %vm71_vm1 = vcmask 130048   ;;  %v43_v4 = vld [vmem:[#allocation5 + $0x20] sm:$0xff]  ;;  %v41_v6 = vld [vmem:[#allocation5 + $0x10] sm:$0xff]  ;;  %vm150_vm2 = vcmask 195584   ;;  %v898_v35 = vmov 24  }
  0x1c   :  { %750 = vmatprep.subr.mxu1 %v896_v0  ;;  %756 = vmatprep.mubr.msk.f32.mxu1 %vm897_vm0, %v896_v0  ;;  %v42_v5 = vld [vmem:[#allocation5 + $0x18] sm:$0xff]  ;;  %v700_v7 = vld [vmem:[#allocation5 + $0xa2] ss:$0 sm:$0xff]  ;;  %v49_v13 = vld [vmem:[#allocation5 + $0x50] sm:$0xff]  ;;  %s899_s0 = smov 1   ;;  %s900_s1 = smov 108  }
  0x1d   :  { %744 = vmatpush3.msra.mxu0 %v40_v1  ;;  %751 = vmatpush3.msra.mxu1 %v43_v4  ;;  %v46_v12 = vld [vmem:[#allocation5 + $0x38] sm:$0xff]  ;;  %v45_v14 = vld [vmem:[#allocation5 + $0x30] sm:$0xff]  ;;  %v48_v15 = vld [vmem:[#allocation5 + $0x48] sm:$0xff]  ;;  %s901_s21 = smov 5   ;;  %s902_s22 = smov 29   ;;  %vm673_vm3 = vcmask 31744  }
  0x1e   :  { %745 = vmatprep.subr.mxu0 %v896_v0  ;;  %752 = vmatprep.subr.mxu1 %v896_v0  ;;  %v44_v16 = vld [vmem:[#allocation5 + $0x28] sm:$0xff]  ;;  %v47_v17 = vld [vmem:[#allocation5 + $0x40] sm:$0xff]  ;;  %v50_v25 = vld [vmem:[#allocation5 + $0x58] sm:$0xff]  ;;  %s903_s23 = smov 103   ;;  %s904_s24 = smov 53   ;;  %vm675_vm4 = vcmask 39936  }
  0x1f   :  { %746 = vmatpush3.msra.mxu0 %v39_v2  ;;  %753 = vmatpush3.msra.mxu1 %v42_v5  ;;  %v702_v18 = vld [vmem:[#allocation5 + $0xa3] ss:$0 sm:$0xff]  ;;  %v52_v23 = vld [vmem:[#allocation5 + $0x68] sm:$0xff]  ;;  %v704_v26 = vld [vmem:[#allocation5 + $0xa4] ss:$0 sm:$0xff]  ;;  %vm677_vm5 = vcmask 236544  }
  0x20   :  { %748 = vmatmul.mubr.msk.f32.vlgmr.msra.gmra.mxu0 %vm71_vm1, %v38_v3  ;;  %759 = vmatprep.subr.mxu0 %v896_v0  ;;  %v51_v24 = vld [vmem:[#allocation5 + $0x60] sm:$0xff]  ;;  %v54_v60 = vld [vmem:[#allocation5 + $0x78] sm:$0xff]  ;;  %v53_v61 = vld [vmem:[#allocation5 + $0x70] sm:$0xff]  ;;  %vm679_vm6 = vcmask 433152   ;;  %s905_s25 = smov [#allocation7]   ;;  %vm681_vm7 = vcmask 564224  }
  0x21   :  { %765 = vmatprep.mubr.msk.f32.mxu0 %vm897_vm0, %v896_v0  ;;  %754 = vmatprep.subr.mxu1 %v896_v0  ;;  %v706_v36 = vld [vmem:[#allocation5 + $0xa5] ss:$0 sm:$0xff]  ;;  %v709_v45 = vld [vmem:[#allocation5 + $0xa0] ss:$0 sm:$0xff]  ;;  %v710_v50 = vld [vmem:[#allocation5 + $0xa1] ss:$0 sm:$0xff] }
  0x22   :  { %755 = vmatpush3.msra.mxu1 %v41_v6  ;;  %760 = vmatpush3.msra.mxu0 %v46_v12  ;;  %v55_v54 = vld [vmem:[#allocation5 + $0x80] sm:$0xff]  ;;  %v58_v4 = vld [vmem:[#allocation5 + $0x98] sm:$0xff]  ;;  %v57_v5 = vld [vmem:[#allocation5 + $0x90] sm:$0xff]  ;;  %s690_s26 = sshll.u32 %s905_s25, 4  ;;  %s691_s26 = int_to_ptr.vmem [resolvable:$true] %s690_s26 }
  0x23   :  { %768 = vmatprep.subr.mxu1 %v896_v0  ;;  %761 = vmatprep.subr.mxu0 %v896_v0  ;;  %v56_v6 = vld [vmem:[#allocation5 + $0x88] sm:$0xff]  ;;  %s866_s27 = scalar_lea.vmem %s691_s26, 128  ;;  %p871_p11 = scmp.lt.s32.totalorder %s691_s26, %s691_s26 }
  0x24   :  { %762 = vmatpush3.msra.mxu0 %v45_v14  ;;  %818 = vset.pattern.permute.xlu0 %v898_v35  ;;  %p867_p10 = scmp.ne.s32.totalorder %s691_s26, %s866_s27  ;;  %p872_p12 = scmp.lt.s32.totalorder %s866_s27, %s866_s27 }
  0x25   :  { %763 = vmatprep.subr.mxu0 %v896_v0  ;;  %819 = vset.pattern.permute.xlu1 %v898_v35 }
  0x26   :  { %764 = vmatpush3.msra.mxu0 %v44_v16  ;;  %p873_p13 = por %p872_p12, %p871_p11 }
  0x27   :  { %777 = vmatprep.subr.mxu0 %v896_v0 }
  0x28   :  { %p874_p0 = pnand %p873_p13, %p867_p10 }
  0xe0   :  { %v141_v8 = vpop.f32.mrf.mxu0 }
  0xe1   :  { %v142_v9 = vadd.f32 %v700_v7, %v141_v8  ;;  %v713_v7 = vld [vmem:[#allocation5 + $0xa6] ss:$0 sm:$0xff] }
  0xe2   :  { %v749_v10 = vpop.f32.mrf.mxu0 }
  0xe3   :  { %v145_v11 = vmax.f32 %v142_v9, 0.0 }
  0xe5   :  { %757 = vmatmul.mubr.msk.f32.vlgmr.msra.gmra.mxu1 %vm150_vm2, %v145_v11 }
  0xe6   :  { %774 = vmatprep.mubr.msk.f32.mxu1 %vm897_vm0, %v896_v0  ;;  %769 = vmatpush3.msra.mxu1 %v49_v13  ;;  %v714_v13 = vld [vmem:[#allocation5 + $0xa7] ss:$0 sm:$0xff] }
  0xe7   :  { %770 = vmatprep.subr.mxu1 %v896_v0 }
  0xe8   :  { %771 = vmatpush3.msra.mxu1 %v48_v15 }
  0xe9   :  { %772 = vmatprep.subr.mxu1 %v896_v0 }
  0xea   :  { %773 = vmatpush3.msra.mxu1 %v47_v17 }
  0xeb   :  { %786 = vmatprep.subr.mxu1 %v896_v0 }
 0x1a5   :  { %v220_v19 = vpop.f32.mrf.mxu1 }
 0x1a6   :  { %v221_v20 = vadd.f32 %v702_v18, %v220_v19 }
 0x1a7   :  { %v758_v21 = vpop.f32.mrf.mxu1 }
 0x1a8   :  { %v949_v22 = vmax.f32 %v221_v20, 0.0 }
 0x1aa   :  { %766 = vmatmul.mubr.msk.f32.vlgmr.msra.gmra.mxu0 %vm150_vm2, %v949_v22  ;;  %775 = vmatmul.mubr.msk.f32.vlgmr.msra.gmra.mxu1 %vm150_vm2, %v949_v22 }
 0x1ab   :  { %783 = vmatprep.mubr.msk.f32.mxu0 %vm897_vm0, %v896_v0  ;;  %792 = vmatprep.mubr.msk.f32.mxu1 %vm897_vm0, %v896_v0 }
 0x1ac   :  { %778 = vmatpush3.msra.mxu0 %v52_v23  ;;  %787 = vmatpush3.msra.mxu1 %v55_v54 }
 0x1ad   :  { %779 = vmatprep.subr.mxu0 %v896_v0  ;;  %788 = vmatprep.subr.mxu1 %v896_v0 }
 0x1ae   :  { %780 = vmatpush3.msra.mxu0 %v51_v24  ;;  %789 = vmatpush3.msra.mxu1 %v54_v60 }
 0x1af   :  { %781 = vmatprep.subr.mxu0 %v896_v0  ;;  %790 = vmatprep.subr.mxu1 %v896_v0 }
 0x1b0   :  { %782 = vmatpush3.msra.mxu0 %v50_v25  ;;  %791 = vmatpush3.msra.mxu1 %v53_v61 }
 0x1b1   :  { %795 = vmatprep.subr.mxu0 %v896_v0 }
 0x26a   :  { %v298_v27 = vpop.f32.mrf.mxu0  ;;  %v373_v28 = vpop.f32.mrf.mxu1 }
 0x26b   :  { %v299_v29 = vadd.f32 %v704_v26, %v298_v27  ;;  %v966_v37 = vadd.f32 %v706_v36, %v373_v28 }
 0x26c   :  { %v767_v30 = vpop.f32.mrf.mxu0  ;;  %v776_v31 = vpop.f32.mrf.mxu1 }
 0x26d   :  { %v302_v32 = vmax.f32 %v299_v29, 0.0 }
 0x26f   :  { %784 = vmatmul.mubr.msk.f32.vlgmr.msra.gmra.mxu0 %vm150_vm2, %v302_v32  ;;  %v451_v33 = vmul.f32 %v302_v32, %v302_v32 }
 0x270   :  { %801 = vmatprep.mubr.msk.f32.mxu0 %vm897_vm0, %v896_v0  ;;  %796 = vmatpush3.msra.mxu0 %v58_v4 }
 0x271   :  { %v452_v34 = vsel %vm150_vm2, %v451_v33, 0.0  ;;  %797 = vmatprep.subr.mxu0 %v896_v0 }
 0x272   :  { %453 = vadd.xlane.f32.xlu0 %v452_v34  ;;  %798 = vmatpush3.msra.mxu0 %v57_v5 }
 0x273   :  { %799 = vmatprep.subr.mxu0 %v896_v0 }
 0x274   :  { %800 = vmatpush3.msra.mxu0 %v56_v6 }
 0x2fb   :  { %v454_v41 = vpop.xlane.xlu0 %453 }
 0x2fc   :  { %v455_v42 = vmax.f32 %v454_v41, 1e-24 }
 0x2fe   :  { %820 = vrsqrt.f32 %v455_v42 }
 0x30b   :  { %v821_v43 = vpop.eup %820 }
 0x30c   :  { %v457_v63 = vmul.f32 %v821_v43, %v302_v32 }
 0x32f   :  { %v446_v38 = vpop.f32.mrf.mxu0 }
 0x330   :  { %v450_v39 = vadd.f32 %v446_v38, %v966_v37  ;;  %v458_v44 = vmul.f32 %v821_v43, %v446_v38 }
 0x331   :  { %v785_v40 = vpop.f32.mrf.mxu0 }
 0x332   :  { %462 = vperm.xlu0 %818, %v450_v39   ;;  %v459_v47 = vadd.f32 %v458_v44, %v966_v37 }
 0x3ad   :  { %v463_v46 = vpop.permute.xlu0 %462 }
 0x3ae   :  { %v469_v48 = vmul.f32 %v709_v45, %v463_v46 }
 0x3b0   :  { %v470_v49 = vadd.f32 %v469_v48, %v459_v47 }
 0x3b2   :  { %v471_v51 = vmax.f32 %v470_v49, 0.0 }
 0x3b4   :  { %v476_v52 = vmul.f32 %v710_v50, %v471_v51 }
 0x3b6   :  { %v477_v53 = vsel %vm150_vm2, %v476_v52, 0.0 }
 0x3b7   :  { %478 = vadd.xlane.f32.xlu1 %v477_v53 }
 0x440   :  { %v479_v55 = vpop.xlane.xlu1 %478 }
 0x441   :  { %v480_v56 = vadd.f32 %v710_v50, %v479_v55 }
 0x443   :  { %v711_v57 = vmul.f32 -1.442695, %v480_v56 }
 0x445   :  { %822 = vpow2.f32 %v711_v57 }
 0x452   :  { %v823_v58 = vpop.eup %822 }
 0x453   :  { %v484_v59 = vadd.f32 1.0, %v823_v58 }
 0x455   :  { %824 = vrcp.f32 %v484_v59 }
 0x462   :  { %v825_v62 = vpop.eup %824 }
 0x463   :  { %489 = vperm.xlu1 %819, %v825_v62  }
 0x4de   :  { %v490_v1 = vpop.permute.xlu1 %489 }
 0x4df   :  { %v492_v2 = vmul.f32 %v490_v1, %v457_v63 }
 0x4e1   :  { %v493_v3 = vadd.f32 %v492_v2, %v949_v22 }
 0x4e3   :  { %793 = vmatmul.mubr.msk.f32.vlgmr.msra.gmra.mxu1 %vm150_vm2, %v493_v3 }
 0x5a3   :  { %v563_v8 = vpop.f32.mrf.mxu1 }
 0x5a4   :  { %v571_v9 = vadd.f32 %v713_v7, %v563_v8  ;;  %651 = vrot.lane.b32.xlu1 %v563_v8, %s899_s0 }
 0x5a5   :  { %v794_v10 = vpop.f32.mrf.mxu1 }
 0x5a6   :  { %v572_v11 = vmax.f32 %v571_v9, 0.0 }
 0x5a8   :  { %659 = vrot.lane.b32.xlu1 %v450_v39, %s900_s1  ;;  %802 = vmatmul.mubr.msk.f32.vlgmr.msra.gmra.mxu0 %vm150_vm2, %v572_v11 }
 0x5ac   :  { %662 = vrot.lane.b32.xlu1 %v493_v3, %s901_s21 }
 0x5b0   :  { %666 = vrot.lane.b32.xlu1 %v457_v63, %s902_s22 }
 0x616   :  { %v652_v12 = vpop.permute.xlu1 %651 }
 0x617   :  { %v654_v0 = vadd.f32 %v652_v12, %v966_v37 }
 0x619   :  { %656 = vrot.lane.b32.xlu1 %v654_v0, %s903_s23 }
 0x61a   :  { %v660_v17 = vpop.permute.xlu1 %659 }
 0x61e   :  { %v663_v18 = vpop.permute.xlu1 %662 }
 0x622   :  { %v667_v19 = vpop.permute.xlu1 %666 }
 0x668   :  { %v646_v14 = vpop.f32.mrf.mxu0 }
 0x669   :  { %v647_v15 = vadd.f32 %v714_v13, %v646_v14 }
 0x66a   :  { %v803_v16 = vpop.f32.mrf.mxu0 }
 0x66b   :  { %670 = vrot.lane.b32.xlu1 %v647_v15, %s904_s24 }
 0x68b   :  { %v657_v20 = vpop.permute.xlu1 %656 }
 0x68c   :  { %v674_v21 = vsel %vm673_vm3, %v657_v20, %v660_v17 }
 0x68d   :  { %v676_v22 = vsel %vm675_vm4, %v674_v21, %v663_v18 }
 0x68e   :  { %v678_v23 = vsel %vm677_vm5, %v676_v22, %v667_v19 }
 0x6dd   :  { %v671_v24 = vpop.permute.xlu1 %670 }
 0x6de   :  { %v680_v25 = vsel %vm679_vm6, %v678_v23, %v671_v24 }
 0x6df   :  { %v682_v26 = vsel %vm681_vm7, %v680_v25, 0.0 }
 0x6e0   :  { %683 = vst [vmem:[#allocation7] sm:$0xff] %v682_v26 }
 0x6e1   :  { %877 = shalt.err (!%p874_p0)
}
 0x6e2   :  { %693 = dma.vmem_to_hbm [thread:$0]  %s691_s26, 128, %s984_s2, [#allocation4]  }
 0x6e3   :  { %890 = dma.done.wait [#allocation4], 128  }
 0x6e4   :  { %891 = vsyncadd [#allocation4], 4294967168 }
 0x6e5   :  { %697 = vsyncpa [#allocation3], 1 }
 0x6e6   :  { %698 = vsyncpa [#allocation6], 1 }
 0x6e7   :  { %699 = vsyncpa [#allocation4], 1 }

</bundles_post_ra>
